<compile_context>
chip_gen: v7x
topology: tpu7x:2x2x1
jax: 0.10.0
libtpu: 0.0.40
codegen_flags: <defaults>
</compile_context>

<pallas_src>
import functools

import numpy as np
import jax
import jax.numpy as jnp
from jax import lax
from jax.experimental import pallas as pl
from jax.experimental.pallas import tpu as pltpu


def _round_up(x, m):
    return (x + m - 1) // m * m


def _vmem_limit(*tile_bytes):
    """Scoped-VMEM limit: double-buffered pipeline footprint + slack, capped."""
    need = 2 * sum(tile_bytes)
    return max(32 << 20, min(int(need * 1.25) + (4 << 20), 100 << 20))


def _logits_lse_kernel(x_ref, w_ref, b_ref, logits_ref, lse_ref, m_sc, l_sc,
                       *, vocab, tn, mask_vocab):
    """Pass 1: logits block = x @ w_j^T + b_j (bf16 MXU operands, f32 accumulate)
    plus an online (running max / sum-exp) logsumexp over the vocab grid axis."""
    j = pl.program_id(1)

    @pl.when(j == 0)
    def _():
        m_sc[...] = jnp.full_like(m_sc, -1e30)   # not -inf: avoids inf-inf -> NaN
        l_sc[...] = jnp.zeros_like(l_sc)

    # Weight block arrives in its native (tn, d_model) layout; contract on the
    # shared d_model axis so the MXU consumes it directly (no transpose/relayout
    # on either side).
    logits = lax.dot_general(
        x_ref[...], w_ref[...],
        dimension_numbers=(((1,), (1,)), ((), ())),
        preferred_element_type=jnp.float32,
    ) + b_ref[...]

    if mask_vocab:
        # Only compiled in when tn does not divide vocab: the tail block's
        # overhanging columns hold unspecified data — keep them out of max/sum-exp.
        col = j * tn + lax.broadcasted_iota(jnp.int32, (1, tn), 1)
        logits = jnp.where(col < vocab, logits, -1e30)

    m_prev = m_sc[...]
    m_new = jnp.maximum(m_prev, jnp.max(logits, axis=-1, keepdims=True))
    l_sc[...] = (l_sc[...] * jnp.exp(m_prev - m_new)
                 + jnp.sum(jnp.exp(logits - m_new), axis=-1, keepdims=True))
    m_sc[...] = m_new

    logits_ref[...] = logits.astype(logits_ref.dtype)   # bf16 intermediate

    @pl.when(j == pl.num_programs(1) - 1)
    def _():
        lse_ref[...] = m_sc[...] + jnp.log(l_sc[...])


def _finalize_kernel(logits_ref, lse_ref, out_ref):
    """Pass 2: log_softmax = logits - logsumexp (pure elementwise, lane-dense out)."""
    out_ref[...] = (logits_ref[...].astype(jnp.float32)
                    - lse_ref[...]).astype(out_ref.dtype)


def generator_forward(x, weight, bias, *, tm=None, tn=None, out_dtype=jnp.float32):
    """Linear(d_model -> vocab) followed by log_softmax(dim=-1).

    x:      (..., d_model)
    weight: (vocab, d_model)   -- nn.Linear convention (never transposed or padded)
    bias:   (vocab,)
    returns (..., vocab) log-probabilities in `out_dtype` (pass jnp.bfloat16 if the
            consumer tolerates it: removes another M*V*2 B of write traffic).
    """
    d_model = x.shape[-1]
    vocab = weight.shape[0]
    lead = x.shape[:-1]
    x2d = x.reshape(-1, d_model)
    M = x2d.shape[0]

    # Tile defaults (sweep per generation):
    #   tm: token tile. Weight re-streaming scales as 1/tm, so take the biggest tile
    #       VMEM allows. 512 fits every generation (incl. v7x's 64 MiB VMEM); tm=1024
    #       is worth a sweep on v5e/v6e (128 MiB). On v7x keep cdiv(M, tm) >= 2 so
    #       both TensorCores get row tiles under the "parallel" M axis.
    #   tn: vocab tile, multiple of 256 preferred (256x256 MXU on v6e/v7x). 1024
    #       default; 2048 fine on v5e/v6e and also on v7x now that the logits
    #       intermediate is bf16.
    if tm is None:
        tm = min(512, _round_up(M, 16))
    if tn is None:
        tn = min(1024, _round_up(vocab, 128))
    tm = _round_up(tm, 16)
    tn = _round_up(tn, 128)

    num_m = pl.cdiv(M, tm)
    num_n = pl.cdiv(vocab, tn)
    mask_vocab = (vocab % tn) != 0

    # bf16 operands feed the MXU at its native rate and halve weight streaming; all
    # accumulation / softmax stats stay f32.  Pass the weight already in bf16 to skip
    # the per-call cast (otherwise a full HBM read+write of the weight).
    x_bf = x2d if x2d.dtype == jnp.bfloat16 else x2d.astype(jnp.bfloat16)
    w_bf = weight if weight.dtype == jnp.bfloat16 else weight.astype(jnp.bfloat16)
    b2d = bias.astype(jnp.float32).reshape(1, vocab)

    cost = pl.CostEstimate(
        flops=2 * M * d_model * vocab,
        transcendentals=M * vocab,
        bytes_accessed=(M * d_model * 2                 # x
                        + num_m * vocab * d_model * 2   # weight, re-streamed per row tile
                        + vocab * 4                     # bias
                        + M * vocab * 2 + M * 4),       # bf16 logits + lse
    )

    vmem1 = _vmem_limit(tm * d_model * 2,   # x tile (bf16)
                        tn * d_model * 2,   # weight tile (bf16)
                        tn * 4,             # bias tile
                        tm * tn * 2,        # bf16 logits tile
                        tm * 4)             # lse tile

    # Pass 1: matmul + online logsumexp. M axis parallel (megacore / v7x dual-TC),
    # vocab axis is the stats reduction -> "arbitrary" and last in the grid.
    logits, lse = pl.pallas_call(
        functools.partial(_logits_lse_kernel, vocab=vocab, tn=tn,
                          mask_vocab=mask_vocab),
        out_shape=(jax.ShapeDtypeStruct((M, vocab), jnp.bfloat16),
                   jax.ShapeDtypeStruct((M, 1), jnp.float32)),
        grid_spec=pltpu.PrefetchScalarGridSpec(
            num_scalar_prefetch=0,
            grid=(num_m, num_n),
            in_specs=[
                pl.BlockSpec((tm, d_model), lambda i, j: (i, 0)),   # x tile (resident over j)
                pl.BlockSpec((tn, d_model), lambda i, j: (j, 0)),   # weight tile (native layout)
                pl.BlockSpec((1, tn), lambda i, j: (0, j)),         # bias tile
            ],
            out_specs=[
                pl.BlockSpec((tm, tn), lambda i, j: (i, j)),        # bf16 logits
                pl.BlockSpec((tm, 1), lambda i, j: (i, 0)),         # logsumexp (resident over j)
            ],
            scratch_shapes=[pltpu.VMEM((tm, 1), jnp.float32),       # running max
                            pltpu.VMEM((tm, 1), jnp.float32)],      # running sum-exp
        ),
        compiler_params=pltpu.CompilerParams(
            dimension_semantics=("parallel", "arbitrary"),
            vmem_limit_bytes=vmem1,
        ),
        cost_estimate=cost,
    )(x_bf, w_bf, b2d)

    # Pass 2: pure HBM streaming -- independent (larger) tiles to cut per-step
    # overhead; every block is independent so both axes are parallel.
    tm2 = min(512, _round_up(M, 16))
    tn2 = min(2048, _round_up(vocab, 128))
    out_bytes = np.dtype(out_dtype).itemsize
    vmem2 = _vmem_limit(tm2 * tn2 * 2, tm2 * 4, tm2 * tn2 * out_bytes)

    out = pl.pallas_call(
        _finalize_kernel,
        out_shape=jax.ShapeDtypeStruct((M, vocab), out_dtype),
        grid_spec=pltpu.PrefetchScalarGridSpec(
            num_scalar_prefetch=0,
            grid=(pl.cdiv(M, tm2), pl.cdiv(vocab, tn2)),
            in_specs=[
                pl.BlockSpec((tm2, tn2), lambda i, j: (i, j)),
                pl.BlockSpec((tm2, 1), lambda i, j: (i, 0)),
            ],
            out_specs=pl.BlockSpec((tm2, tn2), lambda i, j: (i, j)),
        ),
        compiler_params=pltpu.CompilerParams(
            dimension_semantics=("parallel", "parallel"),
            vmem_limit_bytes=vmem2,
        ),
    )(logits, lse)

    # TODO(synk): if the consumer is an NLL/cross-entropy loss, scalar-prefetch the
    # target ids into pass 1, gather the target logit there, and return per-token
    # (target_logit, lse) only — the (M, vocab) log-probs never touch HBM and pass 2
    # disappears (the biggest remaining win for the LM-head + loss path).
    return out.reshape(*lead, vocab)


if __name__ == "__main__":
    # Small shapes consistent with (batch, seq, d_model) -> (batch, seq, vocab).
    # seq=7 exercises the partial-M edge block; vocab=640 with tn=256 exercises vocab
    # tiling (3 blocks) including the in-kernel masking of the partial tail block.
    batch, seq, d_model, vocab = 2, 7, 64, 640

    key = jax.random.PRNGKey(0)
    kx, kw, kb = jax.random.split(key, 3)

    # Deterministic init mimicking nn.Linear's uniform(-1/sqrt(d_model), 1/sqrt(d_model))
    bound = 1.0 / (d_model ** 0.5)
    weight = jax.random.uniform(kw, (vocab, d_model), jnp.float32, -bound, bound)
    bias = jax.random.uniform(kb, (vocab,), jnp.float32, -bound, bound)
    x = jax.random.normal(kx, (batch, seq, d_model), jnp.float32)

    fwd = jax.jit(generator_forward, static_argnames=("tm", "tn", "out_dtype"))
    out = fwd(x, weight, bias, tn=256)
    out = jax.block_until_ready(out)

    # Reference: F.log_softmax(Linear(x), dim=-1) in plain JAX (f32 matmul).
    ref = jax.nn.log_softmax(x @ weight.T + bias, axis=-1)
    assert out.shape == (batch, seq, vocab)
    max_err = float(jnp.max(jnp.abs(out - ref)))
    assert max_err < 2e-2, f"max abs err {max_err}"     # bf16 MXU operands + bf16 logits
    assert jnp.allclose(jnp.sum(jnp.exp(out), axis=-1), 1.0, atol=3e-3)

    print("KERNEL_OK")
</pallas_src>

<mosaic_0001>
module attributes {stable_mosaic.version = 11 : i64} {
  func.func @_finalize_kernel(%arg0: i32, %arg1: i32, %arg2: memref<16x640xbf16, #tpu.memory_space<vmem>>, %arg3: memref<16x1xf32, #tpu.memory_space<vmem>>, %arg4: memref<16x640xf32, #tpu.memory_space<vmem>>) attributes {dimension_semantics = [#tpu.dimension_semantics<parallel>, #tpu.dimension_semantics<parallel>], iteration_bounds = array<i64: 1, 1>, scalar_prefetch = 0 : i64, scratch_operands = 0 : i64, tpu.core_type = #tpu.core_type<tc>, window_params = [{transform_indices = @transform_0, window_bounds = array<i64: 16, 640>}, {transform_indices = @transform_1, window_bounds = array<i64: 16, 1>}, {transform_indices = @transform_2, window_bounds = array<i64: 16, 640>}]} {
    %c0 = arith.constant 0 : index
    %c0_0 = arith.constant 0 : index
    %0 = vector.load %arg2[%c0, %c0_0] : memref<16x640xbf16, #tpu.memory_space<vmem>>, vector<16x640xbf16>
    %1 = arith.extf %0 : vector<16x640xbf16> to vector<16x640xf32>
    %c0_1 = arith.constant 0 : index
    %c0_2 = arith.constant 0 : index
    %2 = vector.load %arg3[%c0_1, %c0_2] : memref<16x1xf32, #tpu.memory_space<vmem>>, vector<16x1xf32>
    %3 = vector.broadcast %2 : vector<16x1xf32> to vector<16x640xf32>
    %4 = arith.subf %1, %3 : vector<16x640xf32>
    %c0_3 = arith.constant 0 : index
    %c0_4 = arith.constant 0 : index
    %5 = vector.load %arg4[%c0_3, %c0_4] : memref<16x640xf32, #tpu.memory_space<vmem>>, vector<16x640xf32>
    tpu.vector_store %arg4[%c0_3, %c0_4], %4 {strides = array<i32>} : memref<16x640xf32, #tpu.memory_space<vmem>>, vector<16x640xf32>,
    return
  }
  func.func @transform_0(%arg0: i32, %arg1: i32) -> (i32, i32) {
    %c0_i32 = arith.constant 0 : i32
    return %arg0, %arg1 : i32, i32
  }
  func.func @transform_1(%arg0: i32, %arg1: i32) -> (i32, i32) {
    %c0_i32 = arith.constant 0 : i32
    %c0_i32_0 = arith.constant 0 : i32
    return %arg0, %c0_i32 : i32, i32
  }
  func.func @transform_2(%arg0: i32, %arg1: i32) -> (i32, i32) {
    %c0_i32 = arith.constant 0 : i32
    return %arg0, %arg1 : i32, i32
  }
}

module attributes {stable_mosaic.version = 11 : i64} {
  func.func @_logits_lse_kernel(%arg0: i32, %arg1: i32, %arg2: memref<16x64xbf16, #tpu.memory_space<vmem>>, %arg3: memref<256x64xbf16, #tpu.memory_space<vmem>>, %arg4: memref<1x256xf32, #tpu.memory_space<vmem>>, %arg5: memref<16x256xbf16, #tpu.memory_space<vmem>>, %arg6: memref<16x1xf32, #tpu.memory_space<vmem>>, %arg7: memref<16x1xf32, #tpu.memory_space<vmem>>, %arg8: memref<16x1xf32, #tpu.memory_space<vmem>>) attributes {dimension_semantics = [#tpu.dimension_semantics<parallel>, #tpu.dimension_semantics<arbitrary>], iteration_bounds = array<i64: 1, 3>, scalar_prefetch = 0 : i64, scratch_operands = 2 : i64, tpu.core_type = #tpu.core_type<tc>, window_params = [{transform_indices = @transform_0, window_bounds = array<i64: 16, 64>}, {transform_indices = @transform_1, window_bounds = array<i64: 256, 64>}, {transform_indices = @transform_2, window_bounds = array<i64: 1, 256>}, {transform_indices = @transform_3, window_bounds = array<i64: 16, 256>}, {transform_indices = @transform_4, window_bounds = array<i64: 16, 1>}]} {
    %c0_i32 = arith.constant 0 : i32
    %0 = arith.cmpi eq, %arg1, %c0_i32 : i32
    %1 = arith.extui %0 : i1 to i32
    %c0_i32_0 = arith.constant 0 : i32
    %2 = arith.cmpi ne, %1, %c0_i32_0 : i32
    scf.if %2 {
      %cst_20 = arith.constant -1.000000e+30 : f32
      %40 = vector.broadcast %cst_20 : f32 to vector<16x1xf32>
      %c0_21 = arith.constant 0 : index
      %c0_22 = arith.constant 0 : index
      %41 = vector.load %arg7[%c0_21, %c0_22] : memref<16x1xf32, #tpu.memory_space<vmem>>, vector<16x1xf32>
      tpu.vector_store %arg7[%c0_21, %c0_22], %40 {strides = array<i32>} : memref<16x1xf32, #tpu.memory_space<vmem>>, vector<16x1xf32>,
      %cst_23 = arith.constant 0.000000e+00 : f32
      %42 = vector.broadcast %cst_23 : f32 to vector<16x1xf32>
      %c0_24 = arith.constant 0 : index
      %c0_25 = arith.constant 0 : index
      %43 = vector.load %arg8[%c0_24, %c0_25] : memref<16x1xf32, #tpu.memory_space<vmem>>, vector<16x1xf32>
      tpu.vector_store %arg8[%c0_24, %c0_25], %42 {strides = array<i32>} : memref<16x1xf32, #tpu.memory_space<vmem>>, vector<16x1xf32>,
    } else {
    }
    %c0 = arith.constant 0 : index
    %c0_1 = arith.constant 0 : index
    %3 = vector.load %arg2[%c0, %c0_1] : memref<16x64xbf16, #tpu.memory_space<vmem>>, vector<16x64xbf16>
    %c0_2 = arith.constant 0 : index
    %c0_3 = arith.constant 0 : index
    %4 = vector.load %arg3[%c0_2, %c0_3] : memref<256x64xbf16, #tpu.memory_space<vmem>>, vector<256x64xbf16>
    %cst = arith.constant dense<0.000000e+00> : vector<16x256xf32>
    %5 = tpu.matmul %3, %4, %cst {dimension_numbers = #tpu.dot_dimension_numbers<[1], [1], [0], [0], [0, 0, 1, 0], [], []>} : vector<16x64xbf16>, vector<256x64xbf16>, vector<16x256xf32> -> vector<16x256xf32>
    %c0_4 = arith.constant 0 : index
    %c0_5 = arith.constant 0 : index
    %6 = vector.load %arg4[%c0_4, %c0_5] : memref<1x256xf32, #tpu.memory_space<vmem>>, vector<1x256xf32>
    %7 = vector.broadcast %6 : vector<1x256xf32> to vector<16x256xf32>
    %8 = arith.addf %5, %7 : vector<16x256xf32>
    %c256_i32 = arith.constant 256 : i32
    %9 = arith.muli %arg1, %c256_i32 : i32
    %10 = tpu.iota {dimensions = array<i32: 1>} : vector<1x256xi32>
    %11 = vector.broadcast %9 : i32 to vector<1x256xi32>
    %12 = arith.addi %11, %10 : vector<1x256xi32>
    %c640_i32 = arith.constant 640 : i32
    %13 = vector.broadcast %c640_i32 : i32 to vector<1x256xi32>
    %14 = arith.cmpi slt, %12, %13 : vector<1x256xi32>
    %cst_6 = arith.constant -1.000000e+30 : f32
    %15 = vector.shape_cast %14 : vector<1x256xi1> to vector<1x256xi1>
    %16 = vector.broadcast %15 : vector<1x256xi1> to vector<16x256xi1>
    %17 = vector.broadcast %cst_6 : f32 to vector<16x256xf32>
    %18 = arith.select %16, %8, %17 : vector<16x256xi1>, vector<16x256xf32>
    %c0_7 = arith.constant 0 : index
    %c0_8 = arith.constant 0 : index
    %19 = vector.load %arg7[%c0_7, %c0_8] : memref<16x1xf32, #tpu.memory_space<vmem>>, vector<16x1xf32>
    %cst_9 = arith.constant dense<0xFF800000> : vector<16xf32>
    %20 = vector.multi_reduction <maximumf>, %18, %cst_9 [1] : vector<16x256xf32> to vector<16xf32>
    %21 = vector.shape_cast %20 : vector<16xf32> to vector<16x1xf32>
    %22 = arith.maximumf %19, %21 : vector<16x1xf32>
    %c0_10 = arith.constant 0 : index
    %c0_11 = arith.constant 0 : index
    %23 = vector.load %arg8[%c0_10, %c0_11] : memref<16x1xf32, #tpu.memory_space<vmem>>, vector<16x1xf32>
    %24 = arith.subf %19, %22 : vector<16x1xf32>
    %25 = math.exp %24 : vector<16x1xf32>
    %26 = arith.mulf %23, %25 : vector<16x1xf32>
    %27 = vector.broadcast %22 : vector<16x1xf32> to vector<16x256xf32>
    %28 = arith.subf %18, %27 : vector<16x256xf32>
    %29 = math.exp %28 : vector<16x256xf32>
    %cst_12 = arith.constant dense<0.000000e+00> : vector<16xf32>
    %30 = vector.multi_reduction <add>, %29, %cst_12 [1] : vector<16x256xf32> to vector<16xf32>
    %31 = vector.shape_cast %30 : vector<16xf32> to vector<16x1xf32>
    %32 = arith.addf %26, %31 : vector<16x1xf32>
    %c0_13 = arith.constant 0 : index
    %c0_14 = arith.constant 0 : index
    %33 = vector.load %arg8[%c0_13, %c0_14] : memref<16x1xf32, #tpu.memory_space<vmem>>, vector<16x1xf32>
    tpu.vector_store %arg8[%c0_13, %c0_14], %32 {strides = array<i32>} : memref<16x1xf32, #tpu.memory_space<vmem>>, vector<16x1xf32>,
    %c0_15 = arith.constant 0 : index
    %c0_16 = arith.constant 0 : index
    %34 = vector.load %arg7[%c0_15, %c0_16] : memref<16x1xf32, #tpu.memory_space<vmem>>, vector<16x1xf32>
    tpu.vector_store %arg7[%c0_15, %c0_16], %22 {strides = array<i32>} : memref<16x1xf32, #tpu.memory_space<vmem>>, vector<16x1xf32>,
    %35 = arith.truncf %18 : vector<16x256xf32> to vector<16x256xbf16>
    %c0_17 = arith.constant 0 : index
    %c0_18 = arith.constant 0 : index
    %36 = vector.load %arg5[%c0_17, %c0_18] : memref<16x256xbf16, #tpu.memory_space<vmem>>, vector<16x256xbf16>
    tpu.vector_store %arg5[%c0_17, %c0_18], %35 {strides = array<i32>} : memref<16x256xbf16, #tpu.memory_space<vmem>>, vector<16x256xbf16>,
    %c2_i32 = arith.constant 2 : i32
    %37 = arith.cmpi eq, %arg1, %c2_i32 : i32
    %38 = arith.extui %37 : i1 to i32
    %c0_i32_19 = arith.constant 0 : i32
    %39 = arith.cmpi ne, %38, %c0_i32_19 : i32
    scf.if %39 {
      %c0_20 = arith.constant 0 : index
      %c0_21 = arith.constant 0 : index
      %40 = vector.load %arg7[%c0_20, %c0_21] : memref<16x1xf32, #tpu.memory_space<vmem>>, vector<16x1xf32>
      %c0_22 = arith.constant 0 : index
      %c0_23 = arith.constant 0 : index
      %41 = vector.load %arg8[%c0_22, %c0_23] : memref<16x1xf32, #tpu.memory_space<vmem>>, vector<16x1xf32>
      %42 = math.log %41 : vector<16x1xf32>
      %43 = arith.addf %40, %42 : vector<16x1xf32>
      %c0_24 = arith.constant 0 : index
      %c0_25 = arith.constant 0 : index
      %44 = vector.load %arg6[%c0_24, %c0_25] : memref<16x1xf32, #tpu.memory_space<vmem>>, vector<16x1xf32>
      tpu.vector_store %arg6[%c0_24, %c0_25], %43 {strides = array<i32>} : memref<16x1xf32, #tpu.memory_space<vmem>>, vector<16x1xf32>,
    } else {
    }
    return
  }
  func.func @transform_0(%arg0: i32, %arg1: i32) -> (i32, i32) {
    %c0_i32 = arith.constant 0 : i32
    %c0_i32_0 = arith.constant 0 : i32
    return %arg0, %c0_i32 : i32, i32
  }
  func.func @transform_1(%arg0: i32, %arg1: i32) -> (i32, i32) {
    %c0_i32 = arith.constant 0 : i32
    %c0_i32_0 = arith.constant 0 : i32
    return %arg1, %c0_i32 : i32, i32
  }
  func.func @transform_2(%arg0: i32, %arg1: i32) -> (i32, i32) {
    %c0_i32 = arith.constant 0 : i32
    %c0_i32_0 = arith.constant 0 : i32
    return %c0_i32, %arg1 : i32, i32
  }
  func.func @transform_3(%arg0: i32, %arg1: i32) -> (i32, i32) {
    %c0_i32 = arith.constant 0 : i32
    return %arg0, %arg1 : i32, i32
  }
  func.func @transform_4(%arg0: i32, %arg1: i32) -> (i32, i32) {
    %c0_i32 = arith.constant 0 : i32
    %c0_i32_0 = arith.constant 0 : i32
    return %arg0, %c0_i32 : i32, i32
  }
}

</mosaic_0001>

<bundles_post_ra>
// kernel: generator_forward.3
= control target key start
LH: loop header
LB: loop body
LE: loop exit
PB: predicated region body
PF: predicated region fallthrough
CT: control target
= control target key end

     0   :  { %v65_v0 = vmov 0   ;;  %s132_s1 = inlined_call_operand.vmem [shape: f32[14,1], index: 1, kind: input, shape index: {}]   ;;  %s133_s0 = inlined_call_operand.vmem [shape: bf16[14,640], index: 0, kind: input, shape index: {}]   ;;  %s134_s2 = inlined_call_operand.vmem [shape: f32[14,640], index: 2, kind: output, shape index: {}]  }
   0x1   :  { %64 = vset.pattern.permute.xlu0 %v65_v0  ;;  %v27_v1 = vld [vmem:[%s132_s1] sm:$0xff]  ;;  %v28_v2 = vld [vmem:[%s132_s1 + $0x8] sm:$0xff]  ;;  %v14_v10 = vld [vmem:[%s133_s0 + $0x14] sm:$0xff] }
   0x2   :  { %31 = vperm.xlu0 %64, %v27_v1   ;;  %v11_v3 = vld [vmem:[%s133_s0] sm:$0xff]  ;;  %v12_v4 = vld [vmem:[%s133_s0 + $0x8] sm:$0xff]  ;;  %v22_v14 = vunpack.c.l.bf16 %v14_v10  ;;  %v23_v15 = vunpack.c.h.bf16 %v14_v10 }
   0x3   :  { %v13_v5 = vld [vmem:[%s133_s0 + $0x10] ss:$20 sps:$4 sm:$0xff]   ;;  %v17_v6 = vunpack.c.l.bf16 %v11_v3  ;;  %v18_v7 = vunpack.c.h.bf16 %v11_v3  ;;  %v19_v8 = vunpack.c.l.bf16 %v12_v4  ;;  %v20_v9 = vunpack.c.h.bf16 %v12_v4  ;;  %v15_v11 = vld [vmem:[%s133_s0 + $0x1c] sm:$0xff] }
   0x4   :  { %v21_v12 = vunpack.c.l.bf16 %v13_v5  ;;  %v24_v16 = vunpack.c.l.bf16 %v15_v11  ;;  %v25_v17 = vunpack.c.h.bf16 %v15_v11  ;;  %v26_v23 = vunpack.c.h.bf16 %v13_v5 }
   0x6   :  { %36 = vperm.xlu0 %64, %v28_v2  }
  0x81   :  { %v32_v13 = vpop.permute.xlu0 %31 }
  0x82   :  { %v39_v18 = vsub.f32 %v17_v6, %v32_v13  ;;  %v40_v19 = vsub.f32 %v18_v7, %v32_v13  ;;  %v41_v20 = vsub.f32 %v19_v8, %v32_v13  ;;  %v42_v21 = vsub.f32 %v20_v9, %v32_v13 }
  0x83   :  { %v43_v22 = vsub.f32 %v21_v12, %v32_v13 }
  0x84   :  { %49 = vst [vmem:[%s134_s2] sm:$0xff] %v39_v18  ;;  %50 = vst [vmem:[%s134_s2 + $0x8] sm:$0xff] %v40_v19 }
  0x85   :  { %51 = vst [vmem:[%s134_s2 + $0x10] sm:$0xff] %v41_v20  ;;  %52 = vst [vmem:[%s134_s2 + $0x18] sm:$0xff] %v42_v21  ;;  %v37_v24 = vpop.permute.xlu0 %36 }
  0x86   :  { %53 = vst [vmem:[%s134_s2 + $0x20] sm:$0xff] %v43_v22  ;;  %v44_v25 = vsub.f32 %v22_v14, %v37_v24  ;;  %v45_v26 = vsub.f32 %v23_v15, %v37_v24  ;;  %v46_v27 = vsub.f32 %v24_v16, %v37_v24  ;;  %v47_v28 = vsub.f32 %v25_v17, %v37_v24 }
  0x87   :  { %v48_v29 = vsub.f32 %v26_v23, %v37_v24 }
  0x88   :  { %54 = vst [vmem:[%s134_s2 + $0x28] sm:$0xff] %v44_v25  ;;  %55 = vst [vmem:[%s134_s2 + $0x30] sm:$0xff] %v45_v26 }
  0x89   :  { %56 = vst [vmem:[%s134_s2 + $0x38] sm:$0xff] %v46_v27  ;;  %57 = vst [vmem:[%s134_s2 + $0x40] sm:$0xff] %v47_v28 }
  0x8a   :  { %58 = vst [vmem:[%s134_s2 + $0x48] sm:$0xff] %v48_v29 }

// kernel: generator_forward.2
= control target key start
LH: loop header
LB: loop body
LE: loop exit
PB: predicated region body
PF: predicated region fallthrough
CT: control target
= control target key end

     0   :  { %s1776_s15 = smov 0   ;;  %s1778_s16 = smov 0   ;;  %s2285_s0 = inlined_call_operand.vmem [shape: bf16[14,64], index: 0, kind: input, shape index: {}]   ;;  %s2286_s1 = inlined_call_operand.vmem [shape: bf16[640,64], index: 1, kind: input, shape index: {}]   ;;  %s2287_s2 = inlined_call_operand.vmem [shape: f32[1,640], index: 2, kind: input, shape index: {}]   ;;  %s2288_s3 = inlined_call_operand.vmem [shape: bf16[14,640], index: 3, kind: output, shape index: {0}]   ;;  %s2289_s4 = inlined_call_operand.vmem [shape: f32[14,1], index: 4, kind: output, shape index: {1}]  }
   0x1   :  { %s1780_s17 = smov 0   ;;  %s1782_s18 = smov 0  }
   0x2   :  { %s1784_s19 = smov 0  }
   0x3 LB: > { %s1273_s20 = sadd.s32 4294967295, %s1680_s19   ;;  %s24_s21 = sadd.s32 1, %s1676_s18  ;;  %s1680_s19 = sphi %s1784_s19, %s15_s19   ;;  %s1676_s18 = sphi %s1782_s18, %s2306_s18   ;;  %s1672_s17 = sphi %s1780_s17, %s2305_s17   ;;  %s1668_s16 = sphi %s1778_s16, %s2304_s16   ;;  %s1664_s15 = sphi %s1776_s15, %s2303_s15  }
   0x4   : > { %p25_p0 = scmp.ge.s32.totalorder %s24_s21, 3  ;;  %s114_s22 = sadd.s32 1, %s1668_s16 }
   0x5   : > { %p124_p1 = scmp.ne.s32.totalorder %s1668_s16, %s1664_s15  ;;  %p125_p2 = scmp.eq.s32.totalorder %s1273_s20, 2 }
   0x6   : > { %s2308_s21 = smov (%p25_p0, %s24_s21), 0  ;;  %p1278_p4 = scmp.ge.s32.totalorder %s1680_s19, 1 }
   0x7   : > { %p1805_p3 = por %p125_p2, %p124_p1  ;;  %s110_s24 = ssub.s32 %s1676_s18, %s2308_s21 }
   0x8   : > { %p217_p5 = scmp.lt.s32.totalorder %s1680_s19, 4  ;;  %p112_p6 = scmp.eq.s32.totalorder %s110_s24, 0 }
   0xa   : > { %p218_p7 = pnand %p1278_p4, %p217_p5 }
   0xb   : > { %s1814_s25 = scalar_select %p112_p6, %s1668_s16, %s114_s22  }
   0xc   : > { %221 = sbr.rel (%p218_p7) target bundleno = 944 (0x3b0), region = 32  ;;  %s254_s26 = sand.u32 (!%p218_p7), 1, %s1664_s15  }
   0xd   : > { %s1280_s27 = sshll.u32 (!%p218_p7), %s1672_s17, 5  ;;  %s1279_s28 = sshll.u32 (!%p218_p7), %s254_s26, 4 }
   0xe   : > { %p275_p8 = scmp.lt.s32.totalorder (!%p218_p7), %s1280_s27, 79  ;;  %s1818_s29 = sshll.u32 (!%p218_p7), %s1672_s17, 1 }
   0xf   : > { %p289_p9 = scmp.lt.s32.totalorder (!%p218_p7), %s1818_s29, 4  ;;  %s1833_s12 = scalar_lea.vmem (!%p218_p7), [#allocation4], %s1279_s28  }
  0x10   : > { %p1283_p10 = scmp.ne.s32.totalorder (!%p218_p7), %s1672_s17, 0 }
  0x13   : > { %s2310_s27 = smov (!%p275_p8, %s1280_s27), 79  ;;  %313 = sbr.rel (%p1283_p10) target bundleno = 26 (0x1a), region = 36 }
  0x14   : > { %s1281_s30 = sshll.u32 %s2310_s27, 2  ;;  %vm314_vm0 = vcmask (!%p1283_p10), 7168   ;;  %v1746_v0 = vmov (!%p1283_p10), -1e+30   ;;  %v1747_v1 = vmov (!%p1283_p10), 0.0  }
  0x15   : > { %s1824_s7 = scalar_lea.vmem %s2286_s1, %s1281_s30  ;;  %315 = vst.msk [vmem:[#allocation2] sm:$0xff] (!%p1283_p10), %vm314_vm0, %v1746_v0  ;;  %316 = vst.msk [vmem:[#allocation2 + $0x8] sm:$0xff] (!%p1283_p10), %vm314_vm0, %v1746_v0 }
  0x16   : > { %s1827_s8 = scalar_select %p289_p9, %s1818_s29, 4 }
  0x17   : > { %317 = vst.msk [vmem:[#allocation3] sm:$0xff] (!%p1283_p10), %vm314_vm0, %v1747_v1  ;;  %318 = vst.msk [vmem:[#allocation3 + $0x8] sm:$0xff] (!%p1283_p10), %vm314_vm0, %v1747_v1 }
  0x18   : > { %s291_s11 = scalar_lea.vmem %s2287_s2, %s1827_s8 }
  0x1a PF: > { %v1545_v2 = vld [vmem:[%s1824_s7 + $0x40] sm:$0xff]   ;;  %vm450_vm1 = vcmask 523264   ;;  %v1547_v4 = vld [vmem:[%s1824_s7 + $0x48] sm:$0xff]   ;;  %v1549_v8 = vld [vmem:[%s1824_s7 + $0x50] sm:$0xff]   ;;  %v355_v27 = vlaneseq  ;;  %s1302_s15 = sshll.u32 %s1672_s17, 8  ;;  %v1748_v55 = vmov 0  }
  0x1b   : > { %v1546_v3 = vld [vmem:[%s1824_s7] sm:$0xff]   ;;  %1362 = vmatprep.subr.msk.bf16.mxu0 %vm450_vm1, %v1545_v2  ;;  %v1548_v6 = vld [vmem:[%s1824_s7 + $0x8] sm:$0xff]   ;;  %v1550_v9 = vld [vmem:[%s1824_s7 + $0x10] sm:$0xff]   ;;  %v549_v31 = vstv %s1302_s15  ;;  %1543 = vset.pattern.permute.xlu1 %v1748_v55  ;;  %vm612_vm4 = vcmask 7168   ;;  %p1305_p11 = scmp.ne.s32.totalorder %s1672_s17, 2 }
  0x1c   : > { %v455_v5 = vsel %vm450_vm1, %v1546_v3, 0  ;;  %v458_v7 = vsel %vm450_vm1, %v1548_v6, 0  ;;  %v1561_v10 = vld [vmem:[%s2285_s0] sm:$0xff]   ;;  %v461_v11 = vsel %vm450_vm1, %v1550_v9, 0  ;;  %v1551_v12 = vld [vmem:[%s1824_s7 + $0x58] sm:$0xff]   ;;  %v1555_v18 = vld [vmem:[%s1824_s7 + $0x68] sm:$0xff]   ;;  %1544 = vset.pattern.permute.xlu0 %v1748_v55 }
  0x1d   : > { %1345 = vmatpush3.bf16.xpose.msra.mxu0 %v455_v5  ;;  %1360 = vmatprep.mubr.msk.bf16.mxu0 %vm450_vm1, %v1561_v10  ;;  %v1552_v13 = vld [vmem:[%s1824_s7 + $0x18] sm:$0xff]   ;;  %v1553_v15 = vld [vmem:[%s1824_s7 + $0x60] sm:$0xff]   ;;  %v1556_v19 = vld [vmem:[%s1824_s7 + $0x28] sm:$0xff]   ;;  %v356_v28 = vshrl.u32 %v355_v27, 7  ;;  %v547_v29 = vand.u32 127, %v355_v27 }
  0x1e   : > { %1363 = vmatprep.subr.msk.bf16.mxu0 %vm450_vm1, %v1547_v4  ;;  %v464_v14 = vsel %vm450_vm1, %v1552_v13, 0  ;;  %v1554_v16 = vld [vmem:[%s1824_s7 + $0x20] sm:$0xff]   ;;  %v470_v20 = vsel %vm450_vm1, %v1556_v19, 0  ;;  %v1557_v21 = vld [vmem:[%s1824_s7 + $0x70] sm:$0xff]   ;;  %v1559_v24 = vld [vmem:[%s1824_s7 + $0x78] sm:$0xff]  }
  0x1f   : > { %v467_v17 = vsel %vm450_vm1, %v1554_v16, 0  ;;  %v1558_v22 = vld [vmem:[%s1824_s7 + $0x30] sm:$0xff]   ;;  %v1560_v25 = vld [vmem:[%s1824_s7 + $0x38] sm:$0xff]   ;;  %v357_v30 = vsub.s32 0, %v356_v28  ;;  %v548_v32 = vadd.s32 128, %v547_v29  ;;  %v361_v34 = vsub.s32 1, %v356_v28 }
  0x20   : > { %v473_v23 = vsel %vm450_vm1, %v1558_v22, 0  ;;  %v476_v26 = vsel %vm450_vm1, %v1560_v25, 0  ;;  %v353_v33 = vld [vmem:[%s291_s11] sm:$0x3]  ;;  %v550_v35 = vadd.s32 %v549_v31, %v547_v29  ;;  %v563_v59 = vld [vmem:[#allocation2 + $0x8] sm:$0xff]  ;;  %v572_v19 = vld [vmem:[#allocation3] sm:$0xff] }
  0x21   : > { %v358_v36 = vrot.slane %v353_v33, %v357_v30  ;;  %v551_v37 = vadd.s32 %v549_v31, %v548_v32  ;;  %v362_v38 = vrot.slane %v353_v33, %v361_v34  ;;  %v562_v56 = vld [vmem:[#allocation2] sm:$0xff] }
  0x22   : > { %vm552_vm2 = vcmp.lt.s32.totalorder %v550_v35, 640 }
  0x23   : > { %vm553_vm3 = vcmp.lt.s32.totalorder %v551_v37, 640 }
  0x25   : > { %1347 = vmatpush3.bf16.xpose.msra.mxu0 %v458_v7 }
  0x26   : > { %1364 = vmatprep.subr.msk.bf16.mxu0 %vm450_vm1, %v1549_v8 }
  0x2d   : > { %1349 = vmatpush3.bf16.xpose.msra.mxu0 %v461_v11 }
  0x2e   : > { %1365 = vmatprep.subr.msk.bf16.mxu0 %vm450_vm1, %v1551_v12 }
  0x35   : > { %1351 = vmatpush3.bf16.xpose.msra.mxu0 %v464_v14 }
  0x36   : > { %1366 = vmatprep.subr.msk.bf16.mxu0 %vm450_vm1, %v1553_v15 }
  0x3d   : > { %1353 = vmatpush3.bf16.xpose.msra.mxu0 %v467_v17 }
  0x3e   : > { %1367 = vmatprep.subr.msk.bf16.mxu0 %vm450_vm1, %v1555_v18 }
  0x45   : > { %1355 = vmatpush3.bf16.xpose.msra.mxu0 %v470_v20 }
  0x46   : > { %1368 = vmatprep.subr.msk.bf16.mxu0 %vm450_vm1, %v1557_v21 }
  0x4d   : > { %1357 = vmatpush3.bf16.xpose.msra.mxu0 %v473_v23  ;;  %v573_v23 = vld [vmem:[#allocation3 + $0x8] sm:$0xff] }
  0x4e   : > { %1369 = vmatprep.subr.msk.bf16.mxu0 %vm450_vm1, %v1559_v24 }
  0x55   : > { %1359 = vmatpush3.bf16.xpose.msra.mxu0 %v476_v26 }
  0x5c   : > { %1361 = vmatmul.mubr.msk.bf16.vlgmr.msra.gmra.mrb[0].mxu0 %vm450_vm1, %v1561_v10 }
 0x12f   : > { %v536_v39 = vpop.f32.mrb[0].mxu0 }
 0x130   : > { %v537_v40 = vadd.f32 %v536_v39, %v358_v36  ;;  %v538_v41 = vpop.f32.mrb[1].mxu0 }
 0x131   : > { %v539_v42 = vadd.f32 %v538_v41, %v362_v38  ;;  %v540_v43 = vpop.f32.mrb[2].mxu0 }
 0x132   : > { %v541_v44 = vadd.f32 %v540_v43, %v358_v36  ;;  %v542_v45 = vpop.f32.mrb[3].mxu0  ;;  %v558_v46 = vsel %vm552_vm2, %v537_v40, -1e+30 }
 0x133   : > { %v543_v47 = vadd.f32 %v542_v45, %v362_v38  ;;  %v559_v48 = vsel %vm553_vm3, %v539_v42, -1e+30 }
 0x134   : > { %v560_v49 = vsel %vm552_vm2, %v541_v44, -1e+30  ;;  %v564_v50 = vmax.f32 %v558_v46, %v559_v48  ;;  %v1337_v51 = vpack.c.bf16 %v559_v48, %v558_v46 }
 0x135   : > { %v561_v52 = vsel %vm553_vm3, %v543_v47, -1e+30 }
 0x136   : > { %v1338_v53 = vpack.c.bf16 %v561_v52, %v560_v49  ;;  %629 = vst [vmem:[%s1833_s12] sm:$0xff] %v1337_v51  ;;  %565 = vmax.xlane.f32.xlu0 %v564_v50  ;;  %v567_v54 = vmax.f32 %v560_v49, %v561_v52 }
 0x138   : > { %630 = vst [vmem:[%s1833_s12 + $0x8] sm:$0xff] %v1338_v53 }
 0x13a   : > { %568 = vmax.xlane.f32.xlu0 %v567_v54 }
 0x1c3   : > { %v566_v57 = vpop.xlane.xlu0 %565 }
 0x1c4   : > { %v570_v58 = vmax.f32 %v562_v56, %v566_v57 }
 0x1c6   : > { %v574_v60 = vsub.f32 %v562_v56, %v570_v58  ;;  %615 = vst.msk [vmem:[#allocation2] sm:$0xff] %vm612_vm4, %v570_v58  ;;  %584 = vperm.xlu1 %1543, %v570_v58  }
 0x1c7   : > { %v569_v61 = vpop.xlane.xlu0 %568 }
 0x1c8   : > { %v571_v62 = vmax.f32 %v563_v59, %v569_v61  ;;  %v576_v16 = vmul.f32 1.442695, %v574_v60 }
 0x1ca   : > { %v575_v63 = vsub.f32 %v563_v59, %v571_v62  ;;  %616 = vst.msk [vmem:[#allocation2 + $0x8] sm:$0xff] %vm612_vm4, %v571_v62  ;;  %589 = vperm.xlu1 %1543, %v571_v62  }
 0x1cc   : > { %v578_v17 = vmul.f32 1.442695, %v575_v63 }
 0x1cd   : > { %v635_v31 = vld [vmem:[#allocation2] sm:$0xff] (!%p1305_p11) }
 0x1d1   : > { %v636_v34 = vld [vmem:[#allocation2 + $0x8] sm:$0xff] (!%p1305_p11) }
 0x245   : > { %v585_v0 = vpop.permute.xlu1 %584 }
 0x246   : > { %v592_v1 = vsub.f32 %v558_v46, %v585_v0  ;;  %v593_v2 = vsub.f32 %v559_v48, %v585_v0 }
 0x248   : > { %v596_v3 = vmul.f32 1.442695, %v592_v1  ;;  %v598_v4 = vmul.f32 1.442695, %v593_v2 }
 0x249   : > { %v590_v5 = vpop.permute.xlu1 %589 }
 0x24a   : > { %1562 = vpow2.f32 %v596_v3  ;;  %v594_v6 = vsub.f32 %v560_v49, %v590_v5  ;;  %v595_v7 = vsub.f32 %v561_v52, %v590_v5 }
 0x24b   : > { %1564 = vpow2.f32 %v598_v4 }
 0x24c   : > { %v600_v8 = vmul.f32 1.442695, %v594_v6  ;;  %v602_v9 = vmul.f32 1.442695, %v595_v7 }
 0x24e   : > { %1566 = vpow2.f32 %v600_v8 }
 0x24f   : > { %1568 = vpow2.f32 %v602_v9 }
 0x250   : > { %1570 = vpow2.f32 %v576_v16 }
 0x251   : > { %1572 = vpow2.f32 %v578_v17 }
 0x254   : > { %v1563_v10 = vpop.eup %1562 }
 0x255   : > { %v1565_v11 = vpop.eup %1564 }
 0x256   : > { %v604_v12 = vadd.f32 %v1565_v11, %v1563_v10 }
 0x258   : > { %v1567_v13 = vpop.eup %1566  ;;  %605 = vadd.xlane.f32.xlu0 %v604_v12 }
 0x259   : > { %v1569_v14 = vpop.eup %1568 }
 0x25a   : > { %v607_v15 = vadd.f32 %v1569_v14, %v1567_v13  ;;  %v1571_v18 = vpop.eup %1570 }
 0x25b   : > { %v580_v20 = vmul.f32 %v1571_v18, %v572_v19  ;;  %v1573_v21 = vpop.eup %1572 }
 0x25c   : > { %608 = vadd.xlane.f32.xlu1 %v607_v15  ;;  %v581_v25 = vmul.f32 %v1573_v21, %v573_v23 }
 0x2e5   : > { %v606_v22 = vpop.xlane.xlu0 %605 }
 0x2e6   : > { %v610_v24 = vadd.f32 %v606_v22, %v580_v20  ;;  %634 = sbr.rel (%p1305_p11) target bundleno = 772 (0x304), region = 40 }
 0x2e8   : > { %613 = vst.msk [vmem:[#allocation3] sm:$0xff] %vm612_vm4, %v610_v24 }
 0x2e9   : > { %v609_v26 = vpop.xlane.xlu1 %608 }
 0x2ea   : > { %v611_v27 = vadd.f32 %v609_v26, %v581_v25 }
 0x2ec   : > { %614 = vst.msk [vmem:[#allocation3 + $0x8] sm:$0xff] %vm612_vm4, %v611_v27 }
 0x2ef   : > { %v637_v28 = vld [vmem:[#allocation3] sm:$0xff] }
 0x2f0   : > { %1574 = vlog2.f32 %v637_v28 }
 0x2f3   : > { %v638_v29 = vld [vmem:[#allocation3 + $0x8] sm:$0xff] }
 0x2f4   : > { %1576 = vlog2.f32 %v638_v29 }
 0x2fa   : > { %v1575_v30 = vpop.eup %1574 }
 0x2fb   : > { %v640_v33 = vmul.f32 0.6931472, %v1575_v30 }
 0x2fd   : > { %v643_v36 = vadd.f32 %v640_v33, %v635_v31 }
 0x2fe   : > { %v1577_v32 = vpop.eup %1576 }
 0x2ff   : > { %v642_v35 = vmul.f32 0.6931472, %v1577_v32  ;;  %645 = vst.msk [vmem:[%s2289_s4] sm:$0xff] %vm612_vm4, %v643_v36 }
 0x301   : > { %v644_v37 = vadd.f32 %v642_v35, %v636_v34 }
 0x303   : > { %646 = vst.msk [vmem:[%s2289_s4 + $0x8] sm:$0xff] %vm612_vm4, %v644_v37 }
 0x304 PF: > { %658 = sbr.rel (!%p1805_p3) target bundleno = 944 (0x3b0), region = 44  ;;  %s661_s30 = ssub.s32 (%p1805_p3), 5, %s1818_s29 }
 0x305   : > { %s1339_s5 = sshll.u32 (%p1805_p3), %s1672_s17, 3  ;;  %p662_p12 = scmp.lt.s32.totalorder (%p1805_p3), %s661_s30, 2 }
 0x306   : > { %s1901_s8 = scalar_lea.vmem (%p1805_p3), %s2288_s3, %s1339_s5  }
 0x30b   : > { %s2312_s30 = smov (!%p662_p12, %s661_s30), 2 }
 0x30c   : > { %s1308_s9 = sshll.u32 %s2312_s30, 7  ;;  %s1903_s10 = sshll.u32 %s2312_s30, 2 }
 0x30d   : > { %p1312_p13 = scmp.eq.s32.totalorder %s1308_s9, 0 }
 0x30e   : > { %p674_p0 = scmp.lt.u32.totalorder (!%p1312_p13), %s1903_s10, 8 }
 0x30f   : > { %673 = sbr.rel (%p1312_p13) target bundleno = 944 (0x3b0), region = 48 }
 0x316   : > { %677 = sbr.rel (%p674_p0) target bundleno = 935 (0x3a7), region = 52  ;;  %s1907_s23 = sand.u32 (!%p674_p0), 7, %s1903_s10  }
 0x317   : > { %p695_p1 = scmp.eq.s32.totalorder (!%p674_p0), %s1907_s23, 0  ;;  %p1313_p2 = scmp.ne.s32.totalorder (!%p674_p0), %s1907_s23, 0 }
 0x31d   : > { %698 = sbr.rel (%p1313_p2) target bundleno = 864 (0x360), region = 67  ;;  %s699_s17 = sshrl.u32 (!%p1313_p2), %s1903_s10, 3 }
 0x31e   : > { %s1914_s29 = sshrl.u32 (!%p1313_p2), %s699_s17, 5 }
 0x31f   : > { %p1314_p3 = scmp.le.s32.totalorder (!%p1313_p2), %s1914_s29, 0 }
 0x324   : > { %1172 = sbr.rel (%p1314_p3) target bundleno = 844 (0x34c), region = 166  ;;  %s2291_s11 = smov (!%p1314_p3), %s1901_s8 }
 0x325   : > { %s2292_s13 = smov (!%p1314_p3), %s1833_s12  ;;  %s1923_s14 = smov (!%p1314_p3), 0  }
 0x326   : > { %s1925_s15 = smov (!%p1314_p3), 0  }
 0x32b LB: >> { %v716_v38 = vld [vmem:[%s1688_s13 + $0x10] sm:$0xff]  ;;  %v718_v39 = vld [vmem:[%s1688_s13 + $0x18] sm:$0xff]  ;;  %v720_v40 = vld [vmem:[%s1688_s13 + $0x20] sm:$0xff]  ;;  %s840_s20 = sadd.s32 1, %s1692_s14  ;;  %s706_s15 = sadd.s32 1, %s1696_s15   ;;  %s1696_s15 = sphi %s1925_s15, %s706_s15   ;;  %s1692_s14 = sphi %s1923_s14, %s2296_s14   ;;  %s1688_s13 = sphi %s2292_s13, %s2295_s13   ;;  %s1684_s11 = sphi %s2291_s11, %s2294_s11  }
 0x32c   : >> { %717 = vst [vmem:[%s1684_s11 + $0x10] sm:$0xff] %v716_v38  ;;  %719 = vst [vmem:[%s1684_s11 + $0x18] sm:$0xff] %v718_v39  ;;  %v722_v41 = vld [vmem:[%s1688_s13 + $0x28] sm:$0xff]  ;;  %v724_v42 = vld [vmem:[%s1688_s13 + $0x30] sm:$0xff]  ;;  %p1966_p4 = scmp.ge.s32.totalorder %s840_s20, %s1914_s29  ;;  %p705_p5 = scmp.ge.s32.totalorder %s706_s15, %s1914_s29 }
 0x32d   : >> { %721 = vst [vmem:[%s1684_s11 + $0x20] sm:$0xff] %v720_v40  ;;  %v726_v43 = vld [vmem:[%s1688_s13 + $0x38] sm:$0xff]  ;;  %723 = vst [vmem:[%s1684_s11 + $0x28] sm:$0xff] %v722_v41  ;;  %v728_v44 = vld [vmem:[%s1688_s13 + $0x40] sm:$0xff] }
 0x32e   : >> { %725 = vst [vmem:[%s1684_s11 + $0x30] sm:$0xff] %v724_v42  ;;  %727 = vst [vmem:[%s1684_s11 + $0x38] sm:$0xff] %v726_v43  ;;  %v730_v45 = vld [vmem:[%s1688_s13 + $0x48] sm:$0xff]  ;;  %v732_v46 = vld [vmem:[%s1688_s13 + $0x50] sm:$0xff]  ;;  %s2314_s20 = smov (%p1966_p4, %s840_s20), 0 }
 0x32f   : >> { %779 = vst [vmem:[%s1684_s11 + $0x1c] sm:$0xff] %v716_v38  ;;  %729 = vst [vmem:[%s1684_s11 + $0x40] sm:$0xff] %v728_v44  ;;  %v734_v47 = vld [vmem:[%s1688_s13 + $0x58] sm:$0xff]  ;;  %v736_v48 = vld [vmem:[%s1688_s13 + $0x60] sm:$0xff]  ;;  %s1315_s24 = sshll.u32 %s2314_s20, 8  ;;  %s2296_s14 = smov %s2314_s20 }
 0x330   : >> { %731 = vst [vmem:[%s1684_s11 + $0x48] sm:$0xff] %v730_v45  ;;  %733 = vst [vmem:[%s1684_s11 + $0x50] sm:$0xff] %v732_v46  ;;  %v738_v49 = vld [vmem:[%s1688_s13 + $0x68] sm:$0xff]  ;;  %v740_v50 = vld [vmem:[%s1688_s13 + $0x70] sm:$0xff]  ;;  %s2021_s26 = scalar_lea.vmem %s1833_s12, %s1315_s24 [#allocation4]   ;;  %s2024_s27 = scalar_lea.vmem %s1901_s8, %s1315_s24  }
 0x331   : >> { %781 = vst [vmem:[%s1684_s11 + $0x24] sm:$0xff] %v718_v39  ;;  %783 = vst [vmem:[%s1684_s11 + $0x2c] sm:$0xff] %v720_v40  ;;  %v742_v51 = vld [vmem:[%s1688_s13 + $0x78] sm:$0xff]  ;;  %v744_v52 = vld [vmem:[%s1688_s13 + $0x80] sm:$0xff] }
 0x332   : >> { %785 = vst [vmem:[%s1684_s11 + $0x34] sm:$0xff] %v722_v41  ;;  %735 = vst [vmem:[%s1684_s11 + $0x58] sm:$0xff] %v734_v47  ;;  %v746_v53 = vld [vmem:[%s1688_s13 + $0x88] sm:$0xff]  ;;  %v748_v54 = vld [vmem:[%s1688_s13 + $0x90] sm:$0xff] }
 0x333   : >> { %737 = vst [vmem:[%s1684_s11 + $0x60] sm:$0xff] %v736_v48  ;;  %739 = vst [vmem:[%s1684_s11 + $0x68] sm:$0xff] %v738_v49  ;;  %v750_v55 = vld [vmem:[%s1688_s13 + $0x98] sm:$0xff]  ;;  %v752_v56 = vld [vmem:[%s1688_s13 + $0xa0] sm:$0xff] }
 0x334   : >> { %787 = vst [vmem:[%s1684_s11 + $0x3c] sm:$0xff] %v724_v42  ;;  %789 = vst [vmem:[%s1684_s11 + $0x44] sm:$0xff] %v726_v43  ;;  %v754_v57 = vld [vmem:[%s1688_s13 + $0xa8] sm:$0xff]  ;;  %v756_v58 = vld [vmem:[%s1688_s13 + $0xb0] sm:$0xff] }
 0x335   : >> { %791 = vst [vmem:[%s1684_s11 + $0x4c] sm:$0xff] %v728_v44  ;;  %741 = vst [vmem:[%s1684_s11 + $0x70] sm:$0xff] %v740_v50  ;;  %v758_v59 = vld [vmem:[%s1688_s13 + $0xb8] sm:$0xff]  ;;  %v760_v60 = vld [vmem:[%s1688_s13 + $0xc0] sm:$0xff] }
 0x336   : >> { %743 = vst [vmem:[%s1684_s11 + $0x78] sm:$0xff] %v742_v51  ;;  %745 = vst [vmem:[%s1684_s11 + $0x80] sm:$0xff] %v744_v52  ;;  %v762_v61 = vld [vmem:[%s1688_s13 + $0xc8] sm:$0xff]  ;;  %v764_v62 = vld [vmem:[%s1688_s13 + $0xd0] sm:$0xff] }
 0x337   : >> { %793 = vst [vmem:[%s1684_s11 + $0x54] sm:$0xff] %v730_v45  ;;  %795 = vst [vmem:[%s1684_s11 + $0x5c] sm:$0xff] %v732_v46  ;;  %v766_v63 = vld [vmem:[%s1688_s13 + $0xd8] sm:$0xff]  ;;  %v768_v0 = vld [vmem:[%s1688_s13 + $0xe0] sm:$0xff] }
 0x338   : >> { %797 = vst [vmem:[%s1684_s11 + $0x64] sm:$0xff] %v734_v47  ;;  %747 = vst [vmem:[%s1684_s11 + $0x88] sm:$0xff] %v746_v53  ;;  %v770_v1 = vld [vmem:[%s1688_s13 + $0xe8] sm:$0xff]  ;;  %v772_v2 = vld [vmem:[%s1688_s13 + $0xf0] sm:$0xff] }
 0x339   : >> { %749 = vst [vmem:[%s1684_s11 + $0x90] sm:$0xff] %v748_v54  ;;  %751 = vst [vmem:[%s1684_s11 + $0x98] sm:$0xff] %v750_v55  ;;  %v774_v3 = vld [vmem:[%s1688_s13 + $0xf8] sm:$0xff]  ;;  %v712_v4 = vld [vmem:[%s1688_s13] sm:$0xff] }
 0x33a   : >> { %799 = vst [vmem:[%s1684_s11 + $0x6c] sm:$0xff] %v736_v48  ;;  %801 = vst [vmem:[%s1684_s11 + $0x74] sm:$0xff] %v738_v49  ;;  %v714_v5 = vld [vmem:[%s1688_s13 + $0x8] sm:$0xff]  ;;  %v838_v6 = vld [vmem:[%s1688_s13 + $0x100] sm:$0xff]  ;;  %s2295_s13 = smov %s2021_s26 }
 0x33b   : >> { %803 = vst [vmem:[%s1684_s11 + $0x7c] sm:$0xff] %v740_v50  ;;  %753 = vst [vmem:[%s1684_s11 + $0xa0] sm:$0xff] %v752_v56 }
 0x33c   : >> { %755 = vst [vmem:[%s1684_s11 + $0xa8] sm:$0xff] %v754_v57  ;;  %757 = vst [vmem:[%s1684_s11 + $0xb0] sm:$0xff] %v756_v58 }
 0x33d   : >> { %805 = vst [vmem:[%s1684_s11 + $0x84] sm:$0xff] %v742_v51  ;;  %807 = vst [vmem:[%s1684_s11 + $0x8c] sm:$0xff] %v744_v52 }
 0x33e   : >> { %809 = vst [vmem:[%s1684_s11 + $0x94] sm:$0xff] %v746_v53  ;;  %759 = vst [vmem:[%s1684_s11 + $0xb8] sm:$0xff] %v758_v59 }
 0x33f   : >> { %761 = vst [vmem:[%s1684_s11 + $0xc0] sm:$0xff] %v760_v60  ;;  %763 = vst [vmem:[%s1684_s11 + $0xc8] sm:$0xff] %v762_v61 }
 0x340   : >> { %811 = vst [vmem:[%s1684_s11 + $0x9c] sm:$0xff] %v748_v54  ;;  %813 = vst [vmem:[%s1684_s11 + $0xa4] sm:$0xff] %v750_v55 }
 0x341   : >> { %815 = vst [vmem:[%s1684_s11 + $0xac] sm:$0xff] %v752_v56  ;;  %765 = vst [vmem:[%s1684_s11 + $0xd0] sm:$0xff] %v764_v62 }
 0x342   : >> { %767 = vst [vmem:[%s1684_s11 + $0xd8] sm:$0xff] %v766_v63  ;;  %769 = vst [vmem:[%s1684_s11 + $0xe0] sm:$0xff] %v768_v0 }
 0x343   : >> { %817 = vst [vmem:[%s1684_s11 + $0xb4] sm:$0xff] %v754_v57  ;;  %819 = vst [vmem:[%s1684_s11 + $0xbc] sm:$0xff] %v756_v58 }
 0x344   : >> { %821 = vst [vmem:[%s1684_s11 + $0xc4] sm:$0xff] %v758_v59  ;;  %771 = vst [vmem:[%s1684_s11 + $0xe8] sm:$0xff] %v770_v1 }
 0x345   : >> { %773 = vst [vmem:[%s1684_s11 + $0xf0] sm:$0xff] %v772_v2  ;;  %775 = vst [vmem:[%s1684_s11 + $0xf8] sm:$0xff] %v774_v3  ;;  %708 = sbr.rel (!%p705_p5) target bundleno = 811 (0x32b), region = 172 }
 0x346   : >> { %823 = vst [vmem:[%s1684_s11 + $0xcc] sm:$0xff] %v760_v60  ;;  %825 = vst [vmem:[%s1684_s11 + $0xd4] sm:$0xff] %v762_v61 }
 0x347   : >> { %827 = vst [vmem:[%s1684_s11 + $0xdc] sm:$0xff] %v764_v62  ;;  %837 = vst [vmem:[%s1684_s11 + $0x104] sm:$0xff] %v774_v3 }
 0x348   : >> { %713 = vst [vmem:[%s1684_s11] sm:$0xff] %v712_v4  ;;  %715 = vst [vmem:[%s1684_s11 + $0x8] sm:$0xff] %v714_v5 }
 0x349   : >> { %777 = vst [vmem:[%s1684_s11 + $0x14] sm:$0xff] %v714_v5  ;;  %829 = vst [vmem:[%s1684_s11 + $0xe4] sm:$0xff] %v766_v63 }
 0x34a   : >> { %831 = vst [vmem:[%s1684_s11 + $0xec] sm:$0xff] %v768_v0  ;;  %833 = vst [vmem:[%s1684_s11 + $0xf4] sm:$0xff] %v770_v1 }
 0x34b   : >> { %835 = vst [vmem:[%s1684_s11 + $0xfc] sm:$0xff] %v772_v2  ;;  %839 = vst [vmem:[%s1684_s11 + $0x10c] sm:$0xff] %v838_v6  ;;  %s2294_s11 = smov %s2024_s27 }
 0x34c PF: > { %s2068_s28 = sand.u32 31, %s699_s17   ;;  %s1340_s30 = sshll.u32 %s1914_s29, 12 }
 0x34d   : > { %s851_s5 = sshra.s32 %s1340_s30, 4  ;;  %p1320_p6 = scmp.le.s32.totalorder %s2068_s28, 0 }
 0x34e   : > { %s2072_s6 = scalar_lea.vmem %s1833_s12, %s851_s5 [#allocation4]   ;;  %s855_s7 = scalar_lea.vmem %s1901_s8, %s851_s5  }
 0x34f   : > { %1186 = sbr.rel (%p1320_p6) target bundleno = 864 (0x360), region = 177  ;;  %s1698_s9 = smov (!%p1320_p6), %s855_s7  }
 0x350   : > { %s1702_s15 = smov (!%p1320_p6), %s2072_s6   ;;  %s1706_s20 = smov (!%p1320_p6), 0  }
 0x351   : > { %s1710_s11 = smov (!%p1320_p6), 0  }
 0x356 LB: >> { %v867_v7 = vld [vmem:[%s1704_s15] sm:$0xff]  ;;  %v869_v8 = vld [vmem:[%s1704_s15 + $0x8] sm:$0xff]  ;;  %s871_s17 = sadd.s32 1, %s1708_s20  ;;  %s861_s11 = sadd.s32 1, %s1712_s11   ;;  %s1712_s11 = sphi %s1710_s11, %s861_s11   ;;  %s1708_s20 = sphi %s1706_s20, %s1707_s20   ;;  %s1704_s15 = sphi %s1702_s15, %s876_s15   ;;  %s1700_s9 = sphi %s1698_s9, %s877_s9  }
 0x357   : >> { %868 = vst [vmem:[%s1700_s9] sm:$0xff] %v867_v7  ;;  %870 = vst [vmem:[%s1700_s9 + $0x14] sm:$0xff] %v869_v8  ;;  %p872_p7 = scmp.ge.s32.totalorder %s871_s17, %s2068_s28  ;;  %p860_p8 = scmp.ge.s32.totalorder %s861_s11, %s2068_s28 }
 0x359   : >> { %s2316_s17 = smov (%p872_p7, %s871_s17), 0  ;;  %863 = sbr.rel (!%p860_p8) target bundleno = 854 (0x356), region = 183 }
 0x35a   : >> { %s1321_s29 = sshll.u32 %s2316_s17, 3  ;;  %s1707_s20 = smov %s2316_s17  }
 0x35b   : >> { %s876_s15 = scalar_lea.vmem %s2072_s6, %s1321_s29 [#allocation4]   ;;  %s877_s9 = scalar_lea.vmem %s855_s7, %s1321_s29  }
 0x360 PF: > { %880 = sbr.rel (%p695_p1) target bundleno = 935 (0x3a7), region = 85  ;;  %s882_s13 = ssub.s32 (!%p695_p1), %s1903_s10, %s1907_s23 }
 0x361   : > { %s886_s14 = sshrl.u32 (!%p695_p1), %s1903_s10, 3  ;;  %s2086_s22 = scalar_lea.vmem (!%p695_p1), %s1833_s12, %s882_s13 [#allocation4] }
 0x362   : > { %s2089_s24 = scalar_lea.vmem (!%p695_p1), %s1901_s8, %s882_s13  ;;  %s2093_s26 = sshrl.u32 (!%p695_p1), %s886_s14, 5 }
 0x363   : > { %p1323_p9 = scmp.le.s32.totalorder (!%p695_p1), %s2093_s26, 0 }
 0x367   : > { %1200 = sbr.rel (%p1323_p9) target bundleno = 911 (0x38f), region = 188  ;;  %s2297_s27 = smov (!%p1323_p9), %s1901_s8 }
 0x368   : > { %s2298_s28 = smov (!%p1323_p9), %s1833_s12  ;;  %s2102_s30 = smov (!%p1323_p9), 0  }
 0x369   : > { %s2104_s5 = smov (!%p1323_p9), 0  }
 0x36e LB: >> { %v903_v9 = vld [vmem:[%s1720_s28 + $0x10] sm:$0xff]  ;;  %v905_v10 = vld [vmem:[%s1720_s28 + $0x18] sm:$0xff]  ;;  %v907_v11 = vld [vmem:[%s1720_s28 + $0x20] sm:$0xff]  ;;  %s1027_s6 = sadd.s32 1, %s1724_s30  ;;  %s893_s5 = sadd.s32 1, %s1728_s5   ;;  %s1728_s5 = sphi %s2104_s5, %s893_s5   ;;  %s1724_s30 = sphi %s2102_s30, %s2302_s30   ;;  %s1720_s28 = sphi %s2298_s28, %s2301_s28   ;;  %s1716_s27 = sphi %s2297_s27, %s2300_s27  }
 0x36f   : >> { %904 = vst [vmem:[%s1716_s27 + $0x10] sm:$0xff] %v903_v9  ;;  %906 = vst [vmem:[%s1716_s27 + $0x18] sm:$0xff] %v905_v10  ;;  %v909_v12 = vld [vmem:[%s1720_s28 + $0x28] sm:$0xff]  ;;  %v911_v13 = vld [vmem:[%s1720_s28 + $0x30] sm:$0xff]  ;;  %p2145_p10 = scmp.ge.s32.totalorder %s1027_s6, %s2093_s26  ;;  %p892_p11 = scmp.ge.s32.totalorder %s893_s5, %s2093_s26 }
 0x370   : >> { %908 = vst [vmem:[%s1716_s27 + $0x20] sm:$0xff] %v907_v11  ;;  %v913_v14 = vld [vmem:[%s1720_s28 + $0x38] sm:$0xff]  ;;  %910 = vst [vmem:[%s1716_s27 + $0x28] sm:$0xff] %v909_v12  ;;  %v915_v15 = vld [vmem:[%s1720_s28 + $0x40] sm:$0xff] }
 0x371   : >> { %912 = vst [vmem:[%s1716_s27 + $0x30] sm:$0xff] %v911_v13  ;;  %914 = vst [vmem:[%s1716_s27 + $0x38] sm:$0xff] %v913_v14  ;;  %v917_v16 = vld [vmem:[%s1720_s28 + $0x48] sm:$0xff]  ;;  %v919_v17 = vld [vmem:[%s1720_s28 + $0x50] sm:$0xff]  ;;  %s2318_s6 = smov (%p2145_p10, %s1027_s6), 0 }
 0x372   : >> { %966 = vst [vmem:[%s1716_s27 + $0x1c] sm:$0xff] %v903_v9  ;;  %916 = vst [vmem:[%s1716_s27 + $0x40] sm:$0xff] %v915_v15  ;;  %v921_v18 = vld [vmem:[%s1720_s28 + $0x58] sm:$0xff]  ;;  %v923_v19 = vld [vmem:[%s1720_s28 + $0x60] sm:$0xff]  ;;  %s1324_s9 = sshll.u32 %s2318_s6, 8  ;;  %s2302_s30 = smov %s2318_s6 }
 0x373   : >> { %918 = vst [vmem:[%s1716_s27 + $0x48] sm:$0xff] %v917_v16  ;;  %920 = vst [vmem:[%s1716_s27 + $0x50] sm:$0xff] %v919_v17  ;;  %v925_v20 = vld [vmem:[%s1720_s28 + $0x68] sm:$0xff]  ;;  %v927_v21 = vld [vmem:[%s1720_s28 + $0x70] sm:$0xff]  ;;  %s2200_s15 = scalar_lea.vmem %s1833_s12, %s1324_s9 [#allocation4]   ;;  %s2203_s20 = scalar_lea.vmem %s1901_s8, %s1324_s9  }
 0x374   : >> { %968 = vst [vmem:[%s1716_s27 + $0x24] sm:$0xff] %v905_v10  ;;  %970 = vst [vmem:[%s1716_s27 + $0x2c] sm:$0xff] %v907_v11  ;;  %v929_v22 = vld [vmem:[%s1720_s28 + $0x78] sm:$0xff]  ;;  %v931_v23 = vld [vmem:[%s1720_s28 + $0x80] sm:$0xff] }
 0x375   : >> { %972 = vst [vmem:[%s1716_s27 + $0x34] sm:$0xff] %v909_v12  ;;  %922 = vst [vmem:[%s1716_s27 + $0x58] sm:$0xff] %v921_v18  ;;  %v933_v24 = vld [vmem:[%s1720_s28 + $0x88] sm:$0xff]  ;;  %v935_v25 = vld [vmem:[%s1720_s28 + $0x90] sm:$0xff] }
 0x376   : >> { %924 = vst [vmem:[%s1716_s27 + $0x60] sm:$0xff] %v923_v19  ;;  %926 = vst [vmem:[%s1716_s27 + $0x68] sm:$0xff] %v925_v20  ;;  %v937_v26 = vld [vmem:[%s1720_s28 + $0x98] sm:$0xff]  ;;  %v939_v27 = vld [vmem:[%s1720_s28 + $0xa0] sm:$0xff] }
 0x377   : >> { %974 = vst [vmem:[%s1716_s27 + $0x3c] sm:$0xff] %v911_v13  ;;  %976 = vst [vmem:[%s1716_s27 + $0x44] sm:$0xff] %v913_v14  ;;  %v941_v28 = vld [vmem:[%s1720_s28 + $0xa8] sm:$0xff]  ;;  %v943_v29 = vld [vmem:[%s1720_s28 + $0xb0] sm:$0xff] }
 0x378   : >> { %978 = vst [vmem:[%s1716_s27 + $0x4c] sm:$0xff] %v915_v15  ;;  %928 = vst [vmem:[%s1716_s27 + $0x70] sm:$0xff] %v927_v21  ;;  %v945_v30 = vld [vmem:[%s1720_s28 + $0xb8] sm:$0xff]  ;;  %v947_v31 = vld [vmem:[%s1720_s28 + $0xc0] sm:$0xff] }
 0x379   : >> { %930 = vst [vmem:[%s1716_s27 + $0x78] sm:$0xff] %v929_v22  ;;  %932 = vst [vmem:[%s1716_s27 + $0x80] sm:$0xff] %v931_v23  ;;  %v949_v32 = vld [vmem:[%s1720_s28 + $0xc8] sm:$0xff]  ;;  %v951_v33 = vld [vmem:[%s1720_s28 + $0xd0] sm:$0xff] }
 0x37a   : >> { %980 = vst [vmem:[%s1716_s27 + $0x54] sm:$0xff] %v917_v16  ;;  %982 = vst [vmem:[%s1716_s27 + $0x5c] sm:$0xff] %v919_v17  ;;  %v953_v34 = vld [vmem:[%s1720_s28 + $0xd8] sm:$0xff]  ;;  %v955_v35 = vld [vmem:[%s1720_s28 + $0xe0] sm:$0xff] }
 0x37b   : >> { %984 = vst [vmem:[%s1716_s27 + $0x64] sm:$0xff] %v921_v18  ;;  %934 = vst [vmem:[%s1716_s27 + $0x88] sm:$0xff] %v933_v24  ;;  %v957_v36 = vld [vmem:[%s1720_s28 + $0xe8] sm:$0xff]  ;;  %v959_v37 = vld [vmem:[%s1720_s28 + $0xf0] sm:$0xff] }
 0x37c   : >> { %936 = vst [vmem:[%s1716_s27 + $0x90] sm:$0xff] %v935_v25  ;;  %938 = vst [vmem:[%s1716_s27 + $0x98] sm:$0xff] %v937_v26  ;;  %v961_v38 = vld [vmem:[%s1720_s28 + $0xf8] sm:$0xff]  ;;  %v899_v39 = vld [vmem:[%s1720_s28] sm:$0xff] }
 0x37d   : >> { %986 = vst [vmem:[%s1716_s27 + $0x6c] sm:$0xff] %v923_v19  ;;  %988 = vst [vmem:[%s1716_s27 + $0x74] sm:$0xff] %v925_v20  ;;  %v901_v40 = vld [vmem:[%s1720_s28 + $0x8] sm:$0xff]  ;;  %v1025_v41 = vld [vmem:[%s1720_s28 + $0x100] sm:$0xff]  ;;  %s2301_s28 = smov %s2200_s15 }
 0x37e   : >> { %990 = vst [vmem:[%s1716_s27 + $0x7c] sm:$0xff] %v927_v21  ;;  %940 = vst [vmem:[%s1716_s27 + $0xa0] sm:$0xff] %v939_v27 }
 0x37f   : >> { %942 = vst [vmem:[%s1716_s27 + $0xa8] sm:$0xff] %v941_v28  ;;  %944 = vst [vmem:[%s1716_s27 + $0xb0] sm:$0xff] %v943_v29 }
 0x380   : >> { %992 = vst [vmem:[%s1716_s27 + $0x84] sm:$0xff] %v929_v22  ;;  %994 = vst [vmem:[%s1716_s27 + $0x8c] sm:$0xff] %v931_v23 }
 0x381   : >> { %996 = vst [vmem:[%s1716_s27 + $0x94] sm:$0xff] %v933_v24  ;;  %946 = vst [vmem:[%s1716_s27 + $0xb8] sm:$0xff] %v945_v30 }
 0x382   : >> { %948 = vst [vmem:[%s1716_s27 + $0xc0] sm:$0xff] %v947_v31  ;;  %950 = vst [vmem:[%s1716_s27 + $0xc8] sm:$0xff] %v949_v32 }
 0x383   : >> { %998 = vst [vmem:[%s1716_s27 + $0x9c] sm:$0xff] %v935_v25  ;;  %1000 = vst [vmem:[%s1716_s27 + $0xa4] sm:$0xff] %v937_v26 }
 0x384   : >> { %1002 = vst [vmem:[%s1716_s27 + $0xac] sm:$0xff] %v939_v27  ;;  %952 = vst [vmem:[%s1716_s27 + $0xd0] sm:$0xff] %v951_v33 }
 0x385   : >> { %954 = vst [vmem:[%s1716_s27 + $0xd8] sm:$0xff] %v953_v34  ;;  %956 = vst [vmem:[%s1716_s27 + $0xe0] sm:$0xff] %v955_v35 }
 0x386   : >> { %1004 = vst [vmem:[%s1716_s27 + $0xb4] sm:$0xff] %v941_v28  ;;  %1006 = vst [vmem:[%s1716_s27 + $0xbc] sm:$0xff] %v943_v29 }
 0x387   : >> { %1008 = vst [vmem:[%s1716_s27 + $0xc4] sm:$0xff] %v945_v30  ;;  %958 = vst [vmem:[%s1716_s27 + $0xe8] sm:$0xff] %v957_v36 }
 0x388   : >> { %960 = vst [vmem:[%s1716_s27 + $0xf0] sm:$0xff] %v959_v37  ;;  %962 = vst [vmem:[%s1716_s27 + $0xf8] sm:$0xff] %v961_v38  ;;  %895 = sbr.rel (!%p892_p11) target bundleno = 878 (0x36e), region = 194 }
 0x389   : >> { %1010 = vst [vmem:[%s1716_s27 + $0xcc] sm:$0xff] %v947_v31  ;;  %1012 = vst [vmem:[%s1716_s27 + $0xd4] sm:$0xff] %v949_v32 }
 0x38a   : >> { %1014 = vst [vmem:[%s1716_s27 + $0xdc] sm:$0xff] %v951_v33  ;;  %1024 = vst [vmem:[%s1716_s27 + $0x104] sm:$0xff] %v961_v38 }
 0x38b   : >> { %900 = vst [vmem:[%s1716_s27] sm:$0xff] %v899_v39  ;;  %902 = vst [vmem:[%s1716_s27 + $0x8] sm:$0xff] %v901_v40 }
 0x38c   : >> { %964 = vst [vmem:[%s1716_s27 + $0x14] sm:$0xff] %v901_v40  ;;  %1016 = vst [vmem:[%s1716_s27 + $0xe4] sm:$0xff] %v953_v34 }
 0x38d   : >> { %1018 = vst [vmem:[%s1716_s27 + $0xec] sm:$0xff] %v955_v35  ;;  %1020 = vst [vmem:[%s1716_s27 + $0xf4] sm:$0xff] %v957_v36 }
 0x38e   : >> { %1022 = vst [vmem:[%s1716_s27 + $0xfc] sm:$0xff] %v959_v37  ;;  %1026 = vst [vmem:[%s1716_s27 + $0x10c] sm:$0xff] %v1025_v41  ;;  %s2300_s27 = smov %s2203_s20 }
 0x38f PF: > { %s2247_s11 = sand.u32 31, %s886_s14   ;;  %s1342_s17 = sshll.u32 %s2093_s26, 12 }
 0x390   : > { %s1038_s29 = sshra.s32 %s1342_s17, 4  ;;  %p1329_p12 = scmp.le.s32.totalorder %s2247_s11, 0 }
 0x391   : > { %s2251_s13 = scalar_lea.vmem %s1833_s12, %s1038_s29 [#allocation4]   ;;  %s1042_s7 = scalar_lea.vmem %s1901_s8, %s1038_s29  }
 0x392   : > { %1214 = sbr.rel (%p1329_p12) target bundleno = 931 (0x3a3), region = 199  ;;  %s1730_s6 = smov (!%p1329_p12), %s1042_s7  }
 0x393   : > { %s1734_s5 = smov (!%p1329_p12), %s2251_s13   ;;  %s1738_s9 = smov (!%p1329_p12), 0  }
 0x394   : > { %s1742_s27 = smov (!%p1329_p12), 0  }
 0x399 LB: >> { %v1054_v42 = vld [vmem:[%s1736_s5] sm:$0xff]  ;;  %v1056_v43 = vld [vmem:[%s1736_s5 + $0x8] sm:$0xff]  ;;  %s1058_s14 = sadd.s32 1, %s1740_s9  ;;  %s1048_s27 = sadd.s32 1, %s1744_s27   ;;  %s1744_s27 = sphi %s1742_s27, %s1048_s27   ;;  %s1740_s9 = sphi %s1738_s9, %s1739_s9   ;;  %s1736_s5 = sphi %s1734_s5, %s1063_s5   ;;  %s1732_s6 = sphi %s1730_s6, %s1064_s6  }
 0x39a   : >> { %1055 = vst [vmem:[%s1732_s6] sm:$0xff] %v1054_v42  ;;  %1057 = vst [vmem:[%s1732_s6 + $0x14] sm:$0xff] %v1056_v43  ;;  %p1059_p13 = scmp.ge.s32.totalorder %s1058_s14, %s2247_s11  ;;  %p1047_p0 = scmp.ge.s32.totalorder %s1048_s27, %s2247_s11 }
 0x39c   : >> { %s2320_s14 = smov (%p1059_p13, %s1058_s14), 0  ;;  %1050 = sbr.rel (!%p1047_p0) target bundleno = 921 (0x399), region = 205 }
 0x39d   : >> { %s1330_s26 = sshll.u32 %s2320_s14, 3  ;;  %s1739_s9 = smov %s2320_s14  }
 0x39e   : >> { %s1063_s5 = scalar_lea.vmem %s2251_s13, %s1330_s26 [#allocation4]   ;;  %s1064_s6 = scalar_lea.vmem %s1042_s7, %s1330_s26  }
 0x3a3 PF: > { %s1749_s28 = smov 0  }
 0x3a4   : > { %s1065_s30 = sshllo.u32 %s1749_s28, %s1907_s23 }
 0x3a5   : > { %v1074_v44 = vld [vmem:[%s2086_s22] sm:%s1065_s30]  ;;  %v1076_v45 = vld [vmem:[%s2086_s22 + $0x8] sm:%s1065_s30] }
 0x3a6   : > { %1075 = vst [vmem:[%s2089_s24] sm:%s1065_s30] %v1074_v44  ;;  %1077 = vst [vmem:[%s2089_s24 + $0x14] sm:%s1065_s30] %v1076_v45 }
 0x3a7 PF: > { %p1332_p1 = scmp.ge.u32.totalorder %s1903_s10, 8 }
 0x3a8   : > { %s1750_s15 = smov (!%p1332_p1), 0  }
 0x3a9   : > { %680 = sbr.rel (%p1332_p1) target bundleno = 944 (0x3b0), region = 56  ;;  %s681_s20 = sshllo.u32 (!%p1332_p1), %s1750_s15, %s1903_s10 }
 0x3aa   : > { %v690_v46 = vld [vmem:[%s1833_s12] sm:%s681_s20] (!%p1332_p1)  ;;  %v692_v47 = vld [vmem:[%s1833_s12 + $0x8] sm:%s681_s20] (!%p1332_p1) }
 0x3ab   : > { %691 = vst [vmem:[%s1901_s8] sm:%s681_s20] (!%p1332_p1), %v690_v46  ;;  %693 = vst [vmem:[%s1901_s8 + $0x14] sm:%s681_s20] (!%p1332_p1), %v692_v47 }
 0x3b0 PF: > { %s15_s19 = sadd.s32 1, %s1680_s19   ;;  %s2303_s15 = smov %s1668_s16 }
 0x3b1   : > { %p12_p2 = scmp.ge.s32.totalorder %s15_s19, 5   ;;  %s2304_s16 = smov %s1814_s25 }
 0x3b2   : > { %s2305_s17 = smov %s1676_s18  ;;  %s2306_s18 = smov %s2308_s21 }
 0x3b3   :  { %14 = sbr.rel (!%p12_p2) target bundleno = 3 (0x3), region = 216 }

</bundles_post_ra>
